<compile_context>
chip_gen: v6e
topology: v6e:2x2x1
jax: 0.10.0
libtpu: 0.0.40
codegen_flags: <defaults>
</compile_context>

<pallas_src>
import functools

import jax
import jax.numpy as jnp
from jax.experimental import pallas as pl
from jax.experimental.pallas import tpu as pltpu

BN_EPS = 1e-5


def _round_up(x, m):
    return ((x + m - 1) // m) * m


# ---------------------------------------------------------------------------
# Fused kernel: whole VointSelfAttention forward for a tile of TP voint rows.
# Row layout: one row per (batch, voint) position, lanes = view*C + channel.
# ---------------------------------------------------------------------------
def _voint_attn_kernel(x_ref, m_ref,
                       we_ref, be_ref, wv_ref, bv_ref,
                       wo_ref, bo_ref, wf_ref, bf_ref,
                       ec_ref, edh_ref,
                       o_ref, *, n_layers, mm_dtype):
    f32 = jnp.float32

    h = x_ref[...]                                    # (TP, V*C) f32 residual stream
    mb = m_ref[...].astype(mm_dtype)                  # (TP, V)   binary view mask

    # Per-view mask expanded onto channel lanes with tiny 0/1 matmuls (MXU has
    # slack; avoids broadcast_to+concatenate XLU / vector-store work).
    m_dh = jnp.dot(mb, edh_ref[...], preferred_element_type=f32)   # (TP, V*dh)
    m_c = jnp.dot(mb, ec_ref[...], preferred_element_type=f32)     # (TP, V*C)

    # Static unroll: n_layers is small here.  For deep nets use lax.fori_loop /
    # a layer grid axis so live ranges stay bounded (see TODOs above).
    for l in range(n_layers):
        # ---- embed_layers[l]: C -> C/heads per view (conv+BN folded), ReLU, mask
        e = jnp.dot(h.astype(mm_dtype), we_ref[l],
                    preferred_element_type=f32) + be_ref[l]
        e = jnp.maximum(e, 0.0) * m_dh                               # (TP, V*dh)

        # ---- embed_atten_layers[l], VALUE chunk only.  The literal per-view
        # softmax has row-sum 1 over j and the value does not depend on j, so
        # attention_out == (query-view mask) * voint_v == voint_v.
        v2 = jnp.dot(e.astype(mm_dtype), wv_ref[l],
                     preferred_element_type=f32) + bv_ref[l]
        v2 = jnp.maximum(v2, 0.0) * m_c                              # (TP, V*C)

        # ---- to_out[l]: C -> C per view, BN folded, ReLU, mask; residual add
        o = jnp.dot(v2.astype(mm_dtype), wo_ref[l],
                    preferred_element_type=f32) + bo_ref[l]
        h = h + jnp.maximum(o, 0.0) * m_c

        # ---- feedforward[l]: C -> C per view, BN folded, ReLU, mask; residual
        f = jnp.dot(h.astype(mm_dtype), wf_ref[l],
                    preferred_element_type=f32) + bf_ref[l]
        h = h + jnp.maximum(f, 0.0) * m_c

    o_ref[...] = h


# ---------------------------------------------------------------------------
# Host-side weight preparation: fold BN into (W', b'), build block-diagonal
# per-view weights (lane-dense matmuls in the kernel), pre-cast to bf16.
# ---------------------------------------------------------------------------
def _block_diag(w, n_views):
    cin, cout = w.shape
    eye = jnp.eye(n_views, dtype=w.dtype)
    return jnp.einsum('vu,io->viuo', eye, w).reshape(n_views * cin, n_views * cout)


def _prepare_kernel_params(params, n_views, channels, heads, mm_dtype):
    C, V = channels, n_views
    dh = C // heads
    we, be, wv, bv, wo, bo, wf, bf = ([] for _ in range(8))
    for lp in params['layers']:
        w, b = lp['embed']
        we.append(_block_diag(w, V).astype(mm_dtype))
        be.append(jnp.tile(b, V)[None, :].astype(jnp.float32))

        # Only the value chunk (columns [2C:3C]) of embed_atten is ever used.
        w, b = lp['embed_atten']
        wv.append(_block_diag(w[:, 2 * C:3 * C], V).astype(mm_dtype))
        bv.append(jnp.tile(b[2 * C:3 * C], V)[None, :].astype(jnp.float32))

        w, b = lp['to_out']
        wo.append(_block_diag(w, V).astype(mm_dtype))
        bo.append(jnp.tile(b, V)[None, :].astype(jnp.float32))

        w, b = lp['feedforward']
        wf.append(_block_diag(w, V).astype(mm_dtype))
        bf.append(jnp.tile(b, V)[None, :].astype(jnp.float32))

    stack = lambda xs: jnp.stack(xs, axis=0)
    # 0/1 per-view expansion matrices: (TP,V) mask @ E -> per-lane mask.
    E_c = jnp.repeat(jnp.eye(V, dtype=jnp.float32), C, axis=1).astype(mm_dtype)
    E_dh = jnp.repeat(jnp.eye(V, dtype=jnp.float32), dh, axis=1).astype(mm_dtype)
    return dict(we=stack(we), be=stack(be), wv=stack(wv), bv=stack(bv),
                wo=stack(wo), bo=stack(bo), wf=stack(wf), bf=stack(bf),
                E_c=E_c, E_dh=E_dh)


# ---------------------------------------------------------------------------
# Public forward.
# ---------------------------------------------------------------------------
def voint_self_attention_forward(params, voints_feats, voints_mask, *,
                                 heads=4, tile_rows=256,
                                 matmul_dtype=jnp.bfloat16, interpret=False):
    B, C, N, V = voints_feats.shape
    L = len(params['layers'])
    VC = V * C

    # (B, C, N, V) -> rows of (view*C + channel), one row per (b, n) position.
    x2 = jnp.transpose(voints_feats, (0, 2, 3, 1)).reshape(B * N, VC).astype(jnp.float32)
    m2 = voints_mask.reshape(B * N, V).astype(jnp.float32)

    P = B * N
    # >= 2 grid steps (feeds both v7x TensorCores) and TP multiple of 16
    # (bf16 sublane packing); cap by tile_rows (sweet spot ~256 post-simplify).
    TP = min(tile_rows, _round_up(max((P + 1) // 2, 16), 16))
    Pp = _round_up(P, TP)
    if Pp != P:   # pad once for the whole network
        x2 = jnp.pad(x2, ((0, Pp - P), (0, 0)))
        m2 = jnp.pad(m2, ((0, Pp - P), (0, 0)))

    kp = _prepare_kernel_params(params, V, C, heads, matmul_dtype)

    kernel = functools.partial(_voint_attn_kernel, n_layers=L, mm_dtype=matmul_dtype)

    def full_spec(shape):
        return pl.BlockSpec(shape, lambda i, _s=len(shape): (0,) * _s)

    out = pl.pallas_call(
        kernel,
        out_shape=jax.ShapeDtypeStruct((Pp, VC), jnp.float32),
        grid_spec=pltpu.PrefetchScalarGridSpec(
            num_scalar_prefetch=0,
            grid=(Pp // TP,),
            in_specs=[
                pl.BlockSpec((TP, VC), lambda i: (i, 0)),
                pl.BlockSpec((TP, V), lambda i: (i, 0)),
                full_spec(kp['we'].shape), full_spec(kp['be'].shape),
                full_spec(kp['wv'].shape), full_spec(kp['bv'].shape),
                full_spec(kp['wo'].shape), full_spec(kp['bo'].shape),
                full_spec(kp['wf'].shape), full_spec(kp['bf'].shape),
                full_spec(kp['E_c'].shape), full_spec(kp['E_dh'].shape),
            ],
            out_specs=pl.BlockSpec((TP, VC), lambda i: (i, 0)),
        ),
        compiler_params=pltpu.CompilerParams(
            dimension_semantics=("parallel",),
            vmem_limit_bytes=32 * 1024 * 1024,
        ),
        interpret=interpret,
    )(x2, m2, kp['we'], kp['be'], kp['wv'], kp['bv'],
      kp['wo'], kp['bo'], kp['wf'], kp['bf'], kp['E_c'], kp['E_dh'])

    out = out[:P].reshape(B, N, V, C)
    return jnp.transpose(out, (0, 3, 1, 2))                 # (B, C, N, V)


# ---------------------------------------------------------------------------
# Deterministic synthetic parameters (Conv2d bias + eval-mode BN folded).
# ---------------------------------------------------------------------------
def _make_conv_bn(key, cin, cout):
    kw, kb, kg, kbe, km, kv = jax.random.split(key, 6)
    w = jax.random.normal(kw, (cin, cout), jnp.float32) / jnp.sqrt(float(cin))
    b = 0.05 * jax.random.normal(kb, (cout,), jnp.float32)
    gamma = 1.0 + 0.1 * jax.random.normal(kg, (cout,), jnp.float32)
    beta = 0.05 * jax.random.normal(kbe, (cout,), jnp.float32)
    mean = 0.05 * jax.random.normal(km, (cout,), jnp.float32)
    var = 1.0 + 0.1 * jax.random.uniform(kv, (cout,), jnp.float32)
    s = gamma / jnp.sqrt(var + BN_EPS)
    return w * s[None, :], b * s + beta - s * mean           # y = x @ W' + b'


def init_params(key, channels_list, heads):
    L = len(channels_list) - 1
    keys = jax.random.split(key, max(L, 1))
    layers = []
    for ii in range(L):
        C = channels_list[ii]
        dh = C // heads
        k = jax.random.split(keys[ii], 4)
        layers.append({
            'embed': _make_conv_bn(k[0], C, dh),
            'embed_atten': _make_conv_bn(k[1], dh, 3 * C),
            'to_out': _make_conv_bn(k[2], C, C),
            'feedforward': _make_conv_bn(k[3], C, C),
        })
    return {'layers': layers}


# ---------------------------------------------------------------------------
# Pure-JAX reference (literal port of the PyTorch forward, full softmax path)
# used to verify that the algebraic simplification in the kernel is exact.
# ---------------------------------------------------------------------------
def _reference_forward(params, voints_feats, voints_mask, heads):
    x = voints_feats.astype(jnp.float32)                    # (B, C, N, V)
    mask = voints_mask.astype(jnp.float32)                  # (B, N, V)
    B, C, N, V = x.shape
    dh = C // heads
    empty = jnp.sum(mask, axis=-1) == 0                     # (B, N)

    def voint_conv(feats, w, b):
        y = jnp.einsum('bcnv,cd->bdnv', feats, w) + b[None, :, None, None]
        y = y * mask[:, None, :, :]
        y = jnp.maximum(y, 0.0)
        return y * mask[:, None, :, :]

    for lp in params['layers']:
        scale = float(C) ** -0.5
        emb = voint_conv(x, *lp['embed'])                    # (B, dh, N, V)
        sup = voint_conv(emb, *lp['embed_atten'])            # (B, 3C, N, V)
        k_, q_, v_ = jnp.split(sup, 3, axis=1)               # voint_k, voint_q, voint_v
        resh = lambda t: t.reshape(B, heads, dh, N, V)
        q, k, v = resh(q_), resh(k_), resh(v_)
        dots = jnp.einsum('bhdnv,bhdnj->bhnvj', q, k) * scale
        dots = jnp.where(empty[:, None, :, None, None], 0.0, dots)
        logits = dots - 1e10 * (1.0 - mask[:, None, :, :, None])
        attn = jax.nn.softmax(logits, axis=-1) * mask[:, None, :, :, None]
        out = jnp.einsum('bhnvj,bhdnv->bhnvd', attn, v)
        out = jnp.transpose(out, (0, 1, 4, 2, 3)).reshape(B, C, N, V)
        out = jnp.where(empty[:, None, :, None], 0.0, out)
        out = voint_conv(out, *lp['to_out'])
        x = x + out
        x = x + voint_conv(x, *lp['feedforward'])
    return x


# ---------------------------------------------------------------------------
if __name__ == "__main__":
    key = jax.random.PRNGKey(0)
    B, C, N_VOINTS, N_VIEWS, HEADS = 2, 32, 16, 4, 4
    CHANNELS = [C, C, C]        # len(channels) - 1 = 2 attention layers

    k_feat, k_mask, k_par = jax.random.split(key, 3)
    voints_feats = jax.random.normal(k_feat, (B, C, N_VOINTS, N_VIEWS), jnp.float32)
    voints_mask = (jax.random.uniform(k_mask, (B, N_VOINTS, N_VIEWS)) > 0.3
                   ).astype(jnp.float32)

    params = init_params(k_par, CHANNELS, HEADS)

    fwd = jax.jit(functools.partial(voint_self_attention_forward, heads=HEADS))
    out = jax.block_until_ready(fwd(params, voints_feats, voints_mask))

    assert out.shape == (B, C, N_VOINTS, N_VIEWS), out.shape
    assert bool(jnp.all(jnp.isfinite(out)))

    # Literal pure-JAX reference check (tolerance absorbs bf16 matmul inputs).
    ref = jax.block_until_ready(
        jax.jit(functools.partial(_reference_forward, heads=HEADS))(
            params, voints_feats, voints_mask))
    rel_err = float(jnp.max(jnp.abs(out - ref)) / (jnp.max(jnp.abs(ref)) + 1e-6))
    assert rel_err < 5e-2, f"mismatch vs reference: rel-max-err={rel_err}"

    print("KERNEL_OK")
</pallas_src>

<mosaic_0001>
module attributes {stable_mosaic.version = 11 : i64} {
  func.func @_voint_attn_kernel(%arg0: i32, %arg1: memref<16x128xf32, #tpu.memory_space<vmem>>, %arg2: memref<16x4xf32, #tpu.memory_space<vmem>>, %arg3: memref<2x128x32xbf16, #tpu.memory_space<vmem>>, %arg4: memref<2x1x32xf32, #tpu.memory_space<vmem>>, %arg5: memref<2x32x128xbf16, #tpu.memory_space<vmem>>, %arg6: memref<2x1x128xf32, #tpu.memory_space<vmem>>, %arg7: memref<2x128x128xbf16, #tpu.memory_space<vmem>>, %arg8: memref<2x1x128xf32, #tpu.memory_space<vmem>>, %arg9: memref<2x128x128xbf16, #tpu.memory_space<vmem>>, %arg10: memref<2x1x128xf32, #tpu.memory_space<vmem>>, %arg11: memref<4x128xbf16, #tpu.memory_space<vmem>>, %arg12: memref<4x32xbf16, #tpu.memory_space<vmem>>, %arg13: memref<16x128xf32, #tpu.memory_space<vmem>>) attributes {dimension_semantics = [#tpu.dimension_semantics<parallel>], iteration_bounds = array<i64: 2>, scalar_prefetch = 0 : i64, scratch_operands = 0 : i64, tpu.core_type = #tpu.core_type<tc>, window_params = [{transform_indices = @transform_0, window_bounds = array<i64: 16, 128>}, {transform_indices = @transform_1, window_bounds = array<i64: 16, 4>}, {pipeline_mode = #tpu.pipeline_mode<synchronous>, transform_indices = @transform_2, window_bounds = array<i64: 2, 128, 32>}, {pipeline_mode = #tpu.pipeline_mode<synchronous>, transform_indices = @transform_3, window_bounds = array<i64: 2, 1, 32>}, {pipeline_mode = #tpu.pipeline_mode<synchronous>, transform_indices = @transform_4, window_bounds = array<i64: 2, 32, 128>}, {pipeline_mode = #tpu.pipeline_mode<synchronous>, transform_indices = @transform_5, window_bounds = array<i64: 2, 1, 128>}, {pipeline_mode = #tpu.pipeline_mode<synchronous>, transform_indices = @transform_6, window_bounds = array<i64: 2, 128, 128>}, {pipeline_mode = #tpu.pipeline_mode<synchronous>, transform_indices = @transform_7, window_bounds = array<i64: 2, 1, 128>}, {pipeline_mode = #tpu.pipeline_mode<synchronous>, transform_indices = @transform_8, window_bounds = array<i64: 2, 128, 128>}, {pipeline_mode = #tpu.pipeline_mode<synchronous>, transform_indices = @transform_9, window_bounds = array<i64: 2, 1, 128>}, {pipeline_mode = #tpu.pipeline_mode<synchronous>, transform_indices = @transform_10, window_bounds = array<i64: 4, 128>}, {pipeline_mode = #tpu.pipeline_mode<synchronous>, transform_indices = @transform_11, window_bounds = array<i64: 4, 32>}, {transform_indices = @transform_12, window_bounds = array<i64: 16, 128>}]} {
    %c0 = arith.constant 0 : index
    %c0_0 = arith.constant 0 : index
    %0 = vector.load %arg1[%c0, %c0_0] : memref<16x128xf32, #tpu.memory_space<vmem>>, vector<16x128xf32>
    %c0_1 = arith.constant 0 : index
    %c0_2 = arith.constant 0 : index
    %1 = vector.load %arg2[%c0_1, %c0_2] : memref<16x4xf32, #tpu.memory_space<vmem>>, vector<16x4xf32>
    %2 = arith.truncf %1 : vector<16x4xf32> to vector<16x4xbf16>
    %c0_3 = arith.constant 0 : index
    %c0_4 = arith.constant 0 : index
    %3 = vector.load %arg12[%c0_3, %c0_4] : memref<4x32xbf16, #tpu.memory_space<vmem>>, vector<4x32xbf16>
    %cst = arith.constant dense<0.000000e+00> : vector<16x32xf32>
    %4 = tpu.matmul %2, %3, %cst {dimension_numbers = #tpu.dot_dimension_numbers<[1], [0], [0], [1], [0, 0, 1, 1], [], []>} : vector<16x4xbf16>, vector<4x32xbf16>, vector<16x32xf32> -> vector<16x32xf32>
    %c0_5 = arith.constant 0 : index
    %c0_6 = arith.constant 0 : index
    %5 = vector.load %arg11[%c0_5, %c0_6] : memref<4x128xbf16, #tpu.memory_space<vmem>>, vector<4x128xbf16>
    %cst_7 = arith.constant dense<0.000000e+00> : vector<16x128xf32>
    %6 = tpu.matmul %2, %5, %cst_7 {dimension_numbers = #tpu.dot_dimension_numbers<[1], [0], [0], [1], [0, 0, 1, 1], [], []>} : vector<16x4xbf16>, vector<4x128xbf16>, vector<16x128xf32> -> vector<16x128xf32>
    %7 = arith.truncf %0 : vector<16x128xf32> to vector<16x128xbf16>
    %c0_8 = arith.constant 0 : index
    %c0_9 = arith.constant 0 : index
    %c0_10 = arith.constant 0 : index
    %8 = vector.load %arg3[%c0_8, %c0_9, %c0_10] : memref<2x128x32xbf16, #tpu.memory_space<vmem>>, vector<1x128x32xbf16>
    %9 = vector.shape_cast %8 : vector<1x128x32xbf16> to vector<128x32xbf16>
    %cst_11 = arith.constant dense<0.000000e+00> : vector<16x32xf32>
    %10 = tpu.matmul %7, %9, %cst_11 {dimension_numbers = #tpu.dot_dimension_numbers<[1], [0], [0], [1], [0, 0, 1, 1], [], []>} : vector<16x128xbf16>, vector<128x32xbf16>, vector<16x32xf32> -> vector<16x32xf32>
    %c0_12 = arith.constant 0 : index
    %c0_13 = arith.constant 0 : index
    %c0_14 = arith.constant 0 : index
    %11 = vector.load %arg4[%c0_12, %c0_13, %c0_14] : memref<2x1x32xf32, #tpu.memory_space<vmem>>, vector<1x1x32xf32>
    %12 = vector.shape_cast %11 : vector<1x1x32xf32> to vector<1x32xf32>
    %13 = vector.broadcast %12 : vector<1x32xf32> to vector<16x32xf32>
    %14 = arith.addf %10, %13 : vector<16x32xf32>
    %cst_15 = arith.constant 0.000000e+00 : f32
    %15 = vector.broadcast %cst_15 : f32 to vector<16x32xf32>
    %16 = arith.maximumf %14, %15 : vector<16x32xf32>
    %17 = arith.mulf %16, %4 : vector<16x32xf32>
    %18 = arith.truncf %17 : vector<16x32xf32> to vector<16x32xbf16>
    %c0_16 = arith.constant 0 : index
    %c0_17 = arith.constant 0 : index
    %c0_18 = arith.constant 0 : index
    %19 = vector.load %arg5[%c0_16, %c0_17, %c0_18] : memref<2x32x128xbf16, #tpu.memory_space<vmem>>, vector<1x32x128xbf16>
    %20 = vector.shape_cast %19 : vector<1x32x128xbf16> to vector<32x128xbf16>
    %cst_19 = arith.constant dense<0.000000e+00> : vector<16x128xf32>
    %21 = tpu.matmul %18, %20, %cst_19 {dimension_numbers = #tpu.dot_dimension_numbers<[1], [0], [0], [1], [0, 0, 1, 1], [], []>} : vector<16x32xbf16>, vector<32x128xbf16>, vector<16x128xf32> -> vector<16x128xf32>
    %c0_20 = arith.constant 0 : index
    %c0_21 = arith.constant 0 : index
    %c0_22 = arith.constant 0 : index
    %22 = vector.load %arg6[%c0_20, %c0_21, %c0_22] : memref<2x1x128xf32, #tpu.memory_space<vmem>>, vector<1x1x128xf32>
    %23 = vector.shape_cast %22 : vector<1x1x128xf32> to vector<1x128xf32>
    %24 = vector.broadcast %23 : vector<1x128xf32> to vector<16x128xf32>
    %25 = arith.addf %21, %24 : vector<16x128xf32>
    %cst_23 = arith.constant 0.000000e+00 : f32
    %26 = vector.broadcast %cst_23 : f32 to vector<16x128xf32>
    %27 = arith.maximumf %25, %26 : vector<16x128xf32>
    %28 = arith.mulf %27, %6 : vector<16x128xf32>
    %29 = arith.truncf %28 : vector<16x128xf32> to vector<16x128xbf16>
    %c0_24 = arith.constant 0 : index
    %c0_25 = arith.constant 0 : index
    %c0_26 = arith.constant 0 : index
    %30 = vector.load %arg7[%c0_24, %c0_25, %c0_26] : memref<2x128x128xbf16, #tpu.memory_space<vmem>>, vector<1x128x128xbf16>
    %31 = vector.shape_cast %30 : vector<1x128x128xbf16> to vector<128x128xbf16>
    %cst_27 = arith.constant dense<0.000000e+00> : vector<16x128xf32>
    %32 = tpu.matmul %29, %31, %cst_27 {dimension_numbers = #tpu.dot_dimension_numbers<[1], [0], [0], [1], [0, 0, 1, 1], [], []>} : vector<16x128xbf16>, vector<128x128xbf16>, vector<16x128xf32> -> vector<16x128xf32>
    %c0_28 = arith.constant 0 : index
    %c0_29 = arith.constant 0 : index
    %c0_30 = arith.constant 0 : index
    %33 = vector.load %arg8[%c0_28, %c0_29, %c0_30] : memref<2x1x128xf32, #tpu.memory_space<vmem>>, vector<1x1x128xf32>
    %34 = vector.shape_cast %33 : vector<1x1x128xf32> to vector<1x128xf32>
    %35 = vector.broadcast %34 : vector<1x128xf32> to vector<16x128xf32>
    %36 = arith.addf %32, %35 : vector<16x128xf32>
    %cst_31 = arith.constant 0.000000e+00 : f32
    %37 = vector.broadcast %cst_31 : f32 to vector<16x128xf32>
    %38 = arith.maximumf %36, %37 : vector<16x128xf32>
    %39 = arith.mulf %38, %6 : vector<16x128xf32>
    %40 = arith.addf %0, %39 : vector<16x128xf32>
    %41 = arith.truncf %40 : vector<16x128xf32> to vector<16x128xbf16>
    %c0_32 = arith.constant 0 : index
    %c0_33 = arith.constant 0 : index
    %c0_34 = arith.constant 0 : index
    %42 = vector.load %arg9[%c0_32, %c0_33, %c0_34] : memref<2x128x128xbf16, #tpu.memory_space<vmem>>, vector<1x128x128xbf16>
    %43 = vector.shape_cast %42 : vector<1x128x128xbf16> to vector<128x128xbf16>
    %cst_35 = arith.constant dense<0.000000e+00> : vector<16x128xf32>
    %44 = tpu.matmul %41, %43, %cst_35 {dimension_numbers = #tpu.dot_dimension_numbers<[1], [0], [0], [1], [0, 0, 1, 1], [], []>} : vector<16x128xbf16>, vector<128x128xbf16>, vector<16x128xf32> -> vector<16x128xf32>
    %c0_36 = arith.constant 0 : index
    %c0_37 = arith.constant 0 : index
    %c0_38 = arith.constant 0 : index
    %45 = vector.load %arg10[%c0_36, %c0_37, %c0_38] : memref<2x1x128xf32, #tpu.memory_space<vmem>>, vector<1x1x128xf32>
    %46 = vector.shape_cast %45 : vector<1x1x128xf32> to vector<1x128xf32>
    %47 = vector.broadcast %46 : vector<1x128xf32> to vector<16x128xf32>
    %48 = arith.addf %44, %47 : vector<16x128xf32>
    %cst_39 = arith.constant 0.000000e+00 : f32
    %49 = vector.broadcast %cst_39 : f32 to vector<16x128xf32>
    %50 = arith.maximumf %48, %49 : vector<16x128xf32>
    %51 = arith.mulf %50, %6 : vector<16x128xf32>
    %52 = arith.addf %40, %51 : vector<16x128xf32>
    %53 = arith.truncf %52 : vector<16x128xf32> to vector<16x128xbf16>
    %c1 = arith.constant 1 : index
    %c0_40 = arith.constant 0 : index
    %c0_41 = arith.constant 0 : index
    %54 = vector.load %arg3[%c1, %c0_40, %c0_41] : memref<2x128x32xbf16, #tpu.memory_space<vmem>>, vector<1x128x32xbf16>
    %55 = vector.shape_cast %54 : vector<1x128x32xbf16> to vector<128x32xbf16>
    %cst_42 = arith.constant dense<0.000000e+00> : vector<16x32xf32>
    %56 = tpu.matmul %53, %55, %cst_42 {dimension_numbers = #tpu.dot_dimension_numbers<[1], [0], [0], [1], [0, 0, 1, 1], [], []>} : vector<16x128xbf16>, vector<128x32xbf16>, vector<16x32xf32> -> vector<16x32xf32>
    %c1_43 = arith.constant 1 : index
    %c0_44 = arith.constant 0 : index
    %c0_45 = arith.constant 0 : index
    %57 = vector.load %arg4[%c1_43, %c0_44, %c0_45] : memref<2x1x32xf32, #tpu.memory_space<vmem>>, vector<1x1x32xf32>
    %58 = vector.shape_cast %57 : vector<1x1x32xf32> to vector<1x32xf32>
    %59 = vector.broadcast %58 : vector<1x32xf32> to vector<16x32xf32>
    %60 = arith.addf %56, %59 : vector<16x32xf32>
    %cst_46 = arith.constant 0.000000e+00 : f32
    %61 = vector.broadcast %cst_46 : f32 to vector<16x32xf32>
    %62 = arith.maximumf %60, %61 : vector<16x32xf32>
    %63 = arith.mulf %62, %4 : vector<16x32xf32>
    %64 = arith.truncf %63 : vector<16x32xf32> to vector<16x32xbf16>
    %c1_47 = arith.constant 1 : index
    %c0_48 = arith.constant 0 : index
    %c0_49 = arith.constant 0 : index
    %65 = vector.load %arg5[%c1_47, %c0_48, %c0_49] : memref<2x32x128xbf16, #tpu.memory_space<vmem>>, vector<1x32x128xbf16>
    %66 = vector.shape_cast %65 : vector<1x32x128xbf16> to vector<32x128xbf16>
    %cst_50 = arith.constant dense<0.000000e+00> : vector<16x128xf32>
    %67 = tpu.matmul %64, %66, %cst_50 {dimension_numbers = #tpu.dot_dimension_numbers<[1], [0], [0], [1], [0, 0, 1, 1], [], []>} : vector<16x32xbf16>, vector<32x128xbf16>, vector<16x128xf32> -> vector<16x128xf32>
    %c1_51 = arith.constant 1 : index
    %c0_52 = arith.constant 0 : index
    %c0_53 = arith.constant 0 : index
    %68 = vector.load %arg6[%c1_51, %c0_52, %c0_53] : memref<2x1x128xf32, #tpu.memory_space<vmem>>, vector<1x1x128xf32>
    %69 = vector.shape_cast %68 : vector<1x1x128xf32> to vector<1x128xf32>
    %70 = vector.broadcast %69 : vector<1x128xf32> to vector<16x128xf32>
    %71 = arith.addf %67, %70 : vector<16x128xf32>
    %cst_54 = arith.constant 0.000000e+00 : f32
    %72 = vector.broadcast %cst_54 : f32 to vector<16x128xf32>
    %73 = arith.maximumf %71, %72 : vector<16x128xf32>
    %74 = arith.mulf %73, %6 : vector<16x128xf32>
    %75 = arith.truncf %74 : vector<16x128xf32> to vector<16x128xbf16>
    %c1_55 = arith.constant 1 : index
    %c0_56 = arith.constant 0 : index
    %c0_57 = arith.constant 0 : index
    %76 = vector.load %arg7[%c1_55, %c0_56, %c0_57] : memref<2x128x128xbf16, #tpu.memory_space<vmem>>, vector<1x128x128xbf16>
    %77 = vector.shape_cast %76 : vector<1x128x128xbf16> to vector<128x128xbf16>
    %cst_58 = arith.constant dense<0.000000e+00> : vector<16x128xf32>
    %78 = tpu.matmul %75, %77, %cst_58 {dimension_numbers = #tpu.dot_dimension_numbers<[1], [0], [0], [1], [0, 0, 1, 1], [], []>} : vector<16x128xbf16>, vector<128x128xbf16>, vector<16x128xf32> -> vector<16x128xf32>
    %c1_59 = arith.constant 1 : index
    %c0_60 = arith.constant 0 : index
    %c0_61 = arith.constant 0 : index
    %79 = vector.load %arg8[%c1_59, %c0_60, %c0_61] : memref<2x1x128xf32, #tpu.memory_space<vmem>>, vector<1x1x128xf32>
    %80 = vector.shape_cast %79 : vector<1x1x128xf32> to vector<1x128xf32>
    %81 = vector.broadcast %80 : vector<1x128xf32> to vector<16x128xf32>
    %82 = arith.addf %78, %81 : vector<16x128xf32>
    %cst_62 = arith.constant 0.000000e+00 : f32
    %83 = vector.broadcast %cst_62 : f32 to vector<16x128xf32>
    %84 = arith.maximumf %82, %83 : vector<16x128xf32>
    %85 = arith.mulf %84, %6 : vector<16x128xf32>
    %86 = arith.addf %52, %85 : vector<16x128xf32>
    %87 = arith.truncf %86 : vector<16x128xf32> to vector<16x128xbf16>
    %c1_63 = arith.constant 1 : index
    %c0_64 = arith.constant 0 : index
    %c0_65 = arith.constant 0 : index
    %88 = vector.load %arg9[%c1_63, %c0_64, %c0_65] : memref<2x128x128xbf16, #tpu.memory_space<vmem>>, vector<1x128x128xbf16>
    %89 = vector.shape_cast %88 : vector<1x128x128xbf16> to vector<128x128xbf16>
    %cst_66 = arith.constant dense<0.000000e+00> : vector<16x128xf32>
    %90 = tpu.matmul %87, %89, %cst_66 {dimension_numbers = #tpu.dot_dimension_numbers<[1], [0], [0], [1], [0, 0, 1, 1], [], []>} : vector<16x128xbf16>, vector<128x128xbf16>, vector<16x128xf32> -> vector<16x128xf32>
    %c1_67 = arith.constant 1 : index
    %c0_68 = arith.constant 0 : index
    %c0_69 = arith.constant 0 : index
    %91 = vector.load %arg10[%c1_67, %c0_68, %c0_69] : memref<2x1x128xf32, #tpu.memory_space<vmem>>, vector<1x1x128xf32>
    %92 = vector.shape_cast %91 : vector<1x1x128xf32> to vector<1x128xf32>
    %93 = vector.broadcast %92 : vector<1x128xf32> to vector<16x128xf32>
    %94 = arith.addf %90, %93 : vector<16x128xf32>
    %cst_70 = arith.constant 0.000000e+00 : f32
    %95 = vector.broadcast %cst_70 : f32 to vector<16x128xf32>
    %96 = arith.maximumf %94, %95 : vector<16x128xf32>
    %97 = arith.mulf %96, %6 : vector<16x128xf32>
    %98 = arith.addf %86, %97 : vector<16x128xf32>
    %c0_71 = arith.constant 0 : index
    %c0_72 = arith.constant 0 : index
    %99 = vector.load %arg13[%c0_71, %c0_72] : memref<16x128xf32, #tpu.memory_space<vmem>>, vector<16x128xf32>
    tpu.vector_store %arg13[%c0_71, %c0_72], %98 {strides = array<i32>} : memref<16x128xf32, #tpu.memory_space<vmem>>, vector<16x128xf32>,
    return
  }
  func.func @transform_0(%arg0: i32) -> (i32, i32) {
    %c0_i32 = arith.constant 0 : i32
    %c0_i32_0 = arith.constant 0 : i32
    return %arg0, %c0_i32 : i32, i32
  }
  func.func @transform_1(%arg0: i32) -> (i32, i32) {
    %c0_i32 = arith.constant 0 : i32
    %c0_i32_0 = arith.constant 0 : i32
    return %arg0, %c0_i32 : i32, i32
  }
  func.func @transform_2(%arg0: i32) -> (i32, i32, i32) {
    %c0_i32 = arith.constant 0 : i32
    %c0_i32_0 = arith.constant 0 : i32
    %c0_i32_1 = arith.constant 0 : i32
    %c0_i32_2 = arith.constant 0 : i32
    return %c0_i32, %c0_i32_0, %c0_i32_1 : i32, i32, i32
  }
  func.func @transform_3(%arg0: i32) -> (i32, i32, i32) {
    %c0_i32 = arith.constant 0 : i32
    %c0_i32_0 = arith.constant 0 : i32
    %c0_i32_1 = arith.constant 0 : i32
    %c0_i32_2 = arith.constant 0 : i32
    return %c0_i32, %c0_i32_0, %c0_i32_1 : i32, i32, i32
  }
  func.func @transform_4(%arg0: i32) -> (i32, i32, i32) {
    %c0_i32 = arith.constant 0 : i32
    %c0_i32_0 = arith.constant 0 : i32
    %c0_i32_1 = arith.constant 0 : i32
    %c0_i32_2 = arith.constant 0 : i32
    return %c0_i32, %c0_i32_0, %c0_i32_1 : i32, i32, i32
  }
  func.func @transform_5(%arg0: i32) -> (i32, i32, i32) {
    %c0_i32 = arith.constant 0 : i32
    %c0_i32_0 = arith.constant 0 : i32
    %c0_i32_1 = arith.constant 0 : i32
    %c0_i32_2 = arith.constant 0 : i32
    return %c0_i32, %c0_i32_0, %c0_i32_1 : i32, i32, i32
  }
  func.func @transform_6(%arg0: i32) -> (i32, i32, i32) {
    %c0_i32 = arith.constant 0 : i32
    %c0_i32_0 = arith.constant 0 : i32
    %c0_i32_1 = arith.constant 0 : i32
    %c0_i32_2 = arith.constant 0 : i32
    return %c0_i32, %c0_i32_0, %c0_i32_1 : i32, i32, i32
  }
  func.func @transform_7(%arg0: i32) -> (i32, i32, i32) {
    %c0_i32 = arith.constant 0 : i32
    %c0_i32_0 = arith.constant 0 : i32
    %c0_i32_1 = arith.constant 0 : i32
    %c0_i32_2 = arith.constant 0 : i32
    return %c0_i32, %c0_i32_0, %c0_i32_1 : i32, i32, i32
  }
  func.func @transform_8(%arg0: i32) -> (i32, i32, i32) {
    %c0_i32 = arith.constant 0 : i32
    %c0_i32_0 = arith.constant 0 : i32
    %c0_i32_1 = arith.constant 0 : i32
    %c0_i32_2 = arith.constant 0 : i32
    return %c0_i32, %c0_i32_0, %c0_i32_1 : i32, i32, i32
  }
  func.func @transform_9(%arg0: i32) -> (i32, i32, i32) {
    %c0_i32 = arith.constant 0 : i32
    %c0_i32_0 = arith.constant 0 : i32
    %c0_i32_1 = arith.constant 0 : i32
    %c0_i32_2 = arith.constant 0 : i32
    return %c0_i32, %c0_i32_0, %c0_i32_1 : i32, i32, i32
  }
  func.func @transform_10(%arg0: i32) -> (i32, i32) {
    %c0_i32 = arith.constant 0 : i32
    %c0_i32_0 = arith.constant 0 : i32
    %c0_i32_1 = arith.constant 0 : i32
    return %c0_i32, %c0_i32_0 : i32, i32
  }
  func.func @transform_11(%arg0: i32) -> (i32, i32) {
    %c0_i32 = arith.constant 0 : i32
    %c0_i32_0 = arith.constant 0 : i32
    %c0_i32_1 = arith.constant 0 : i32
    return %c0_i32, %c0_i32_0 : i32, i32
  }
  func.func @transform_12(%arg0: i32) -> (i32, i32) {
    %c0_i32 = arith.constant 0 : i32
    %c0_i32_0 = arith.constant 0 : i32
    return %arg0, %c0_i32 : i32, i32
  }
}

</mosaic_0001>

<bundles_post_ra>
// kernel: tile.47
= control target key start
LH: loop header
LB: loop body
LE: loop exit
PB: predicated region body
PF: predicated region fallthrough
CT: control target
= control target key end

     0   :  { %s22_s0 = inlined_call_operand.vmem [shape: f32[32], index: 0, kind: input, shape index: {}]   ;;  %s23_s1 = inlined_call_operand.vmem [shape: f32[4,32], index: 1, kind: output, shape index: {}]  }
   0x1   :  { %v4_v0 = vld [vmem:[%s22_s0] ss:$0 sm:$0xff] }
   0x2   :  { %5 = vst [vmem:[%s23_s1] sm:$0xf] %v4_v0 }

// kernel: tile.74
= control target key start
LH: loop header
LB: loop body
LE: loop exit
PB: predicated region body
PF: predicated region fallthrough
CT: control target
= control target key end

     0   :  { %vm8_vm0 = vcmask 261120   ;;  %s40_s8 = smov 32   ;;  %s41_s9 = smov 64   ;;  %vm14_vm1 = vcmask 1048320   ;;  %vm20_vm2 = vcmask 785920   ;;  %vm26_vm3 = vcmask 523520   ;;  %s58_s0 = inlined_call_operand.vmem [shape: f32[4,32], index: 0, kind: input, shape index: {}]   ;;  %s59_s1 = inlined_call_operand.vmem [shape: f32[1,1,128], index: 1, kind: output, shape index: {}]  }
   0x1   :  { %v5_v0 = vld [vmem:[%s58_s0] sm:$0xf]  ;;  %s39_s0 = smov 96  }
   0x2   :  { %6 = vst [vmem:[#allocation1] sm:$0xf] %v5_v0 }
   0x9   :  { %v11_v1 = vld [vmem:[#allocation1 + $0x3] sm:$0x1]   ;;  %v23_v2 = vld [vmem:[#allocation1 + $0x1] sm:$0x1]   ;;  %v7_v3 = vld [vmem:[#allocation1] sm:$0x1]  }
   0xa   :  { %12 = vrot.lane.b32.xlu0 %v11_v1, %s39_s0  ;;  %24 = vrot.lane.b32.xlu1 %v23_v2, %s40_s8  ;;  %v17_v4 = vld [vmem:[#allocation1 + $0x2] sm:$0x1]   ;;  %9 = vst.msk [vmem:[#allocation0] sm:$0x1] %vm8_vm0, %v7_v3  }
   0xe   :  { %18 = vrot.lane.b32.xlu0 %v17_v4, %s41_s9 }
  0x7c   :  { %v13_v5 = vpop.permute.xlu0 %12   ;;  %v25_v6 = vpop.permute.xlu1 %24  }
  0x7d   :  { %15 = vst.msk [vmem:[#allocation0] sm:$0x1] %vm14_vm1, %v13_v5  }
  0x80   :  { %v19_v7 = vpop.permute.xlu0 %18  }
  0x81   :  { %21 = vst.msk [vmem:[#allocation0] sm:$0x1] %vm20_vm2, %v19_v7  }
  0x82   :  { %27 = vst.msk [vmem:[#allocation0] sm:$0x1] %vm26_vm3, %v25_v6  }
  0x89   :  { %v32_v8 = vld [vmem:[#allocation0] sm:$0x1] }
  0x8a   :  { %35 = vst [vmem:[%s59_s1] sm:$0x1] %v32_v8 }

// kernel: tile.43
= control target key start
LH: loop header
LB: loop body
LE: loop exit
PB: predicated region body
PF: predicated region fallthrough
CT: control target
= control target key end

     0   :  { %s22_s0 = inlined_call_operand.vmem [shape: f32[8], index: 0, kind: input, shape index: {}]   ;;  %s23_s1 = inlined_call_operand.vmem [shape: f32[4,8], index: 1, kind: output, shape index: {}]  }
   0x1   :  { %v4_v0 = vld [vmem:[%s22_s0] ss:$0 sm:$0xff] }
   0x2   :  { %5 = vst [vmem:[%s23_s1] sm:$0xf] %v4_v0 }

// kernel: tile.72
= control target key start
LH: loop header
LB: loop body
LE: loop exit
PB: predicated region body
PF: predicated region fallthrough
CT: control target
= control target key end

     0   :  { %vm8_vm0 = vcmask 64512   ;;  %s40_s8 = smov 8   ;;  %s41_s9 = smov 16   ;;  %vm14_vm1 = vcmask 261312   ;;  %vm20_vm2 = vcmask 195712   ;;  %vm26_vm3 = vcmask 130112   ;;  %s58_s0 = inlined_call_operand.vmem [shape: f32[4,8], index: 0, kind: input, shape index: {}]   ;;  %s59_s1 = inlined_call_operand.vmem [shape: f32[1,1,32], index: 1, kind: output, shape index: {}]  }
   0x1   :  { %v5_v0 = vld [vmem:[%s58_s0] sm:$0xf]  ;;  %s39_s0 = smov 24  }
   0x2   :  { %6 = vst [vmem:[#allocation1] sm:$0xf] %v5_v0 }
   0x9   :  { %v11_v1 = vld [vmem:[#allocation1 + $0x3] sm:$0x1]   ;;  %v23_v2 = vld [vmem:[#allocation1 + $0x1] sm:$0x1]   ;;  %v7_v3 = vld [vmem:[#allocation1] sm:$0x1]  }
   0xa   :  { %12 = vrot.lane.b32.xlu0 %v11_v1, %s39_s0  ;;  %24 = vrot.lane.b32.xlu1 %v23_v2, %s40_s8  ;;  %v17_v4 = vld [vmem:[#allocation1 + $0x2] sm:$0x1]   ;;  %9 = vst.msk [vmem:[#allocation0] sm:$0x1] %vm8_vm0, %v7_v3  }
   0xe   :  { %18 = vrot.lane.b32.xlu0 %v17_v4, %s41_s9 }
  0x7c   :  { %v13_v5 = vpop.permute.xlu0 %12   ;;  %v25_v6 = vpop.permute.xlu1 %24  }
  0x7d   :  { %15 = vst.msk [vmem:[#allocation0] sm:$0x1] %vm14_vm1, %v13_v5  }
  0x80   :  { %v19_v7 = vpop.permute.xlu0 %18  }
  0x81   :  { %21 = vst.msk [vmem:[#allocation0] sm:$0x1] %vm20_vm2, %v19_v7  }
  0x82   :  { %27 = vst.msk [vmem:[#allocation0] sm:$0x1] %vm26_vm3, %v25_v6  }
  0x89   :  { %v32_v8 = vld [vmem:[#allocation0] sm:$0x1] }
  0x8a   :  { %35 = vst [vmem:[%s59_s1] sm:$0x1] %v32_v8 }

// kernel: voint_self_attention_forward.1
= control target key start
LH: loop header
LB: loop body
LE: loop exit
PB: predicated region body
PF: predicated region fallthrough
CT: control target
= control target key end

     0   :  { %s1955_s21 = smov 0   ;;  %s2286_s0 = inlined_call_operand.vmem [shape: f32[32,128], index: 0, kind: input, shape index: {}]   ;;  %s2287_s1 = inlined_call_operand.vmem [shape: f32[32,4], index: 1, kind: input, shape index: {}]   ;;  %s2288_s2 = inlined_call_operand.vmem [shape: bf16[2,128,32], index: 2, kind: input, shape index: {}]   ;;  %s2289_s3 = inlined_call_operand.vmem [shape: f32[2,1,32], index: 3, kind: input, shape index: {}]   ;;  %s2290_s4 = inlined_call_operand.vmem [shape: bf16[2,32,128], index: 4, kind: input, shape index: {}]   ;;  %s2291_s5 = inlined_call_operand.vmem [shape: f32[2,1,128], index: 5, kind: input, shape index: {}]   ;;  %s2292_s6 = inlined_call_operand.vmem [shape: bf16[2,128,128], index: 6, kind: input, shape index: {}]   ;;  %s2293_s7 = inlined_call_operand.vmem [shape: f32[2,1,128], index: 7, kind: input, shape index: {}]   ;;  %s2294_s8 = inlined_call_operand.vmem [shape: bf16[2,128,128], index: 8, kind: input, shape index: {}]   ;;  %s2295_s9 = inlined_call_operand.vmem [shape: f32[2,1,128], index: 9, kind: input, shape index: {}]   ;;  %s2296_s10 = inlined_call_operand.vmem [shape: bf16[4,128], index: 10, kind: input, shape index: {}]   ;;  %s2297_s11 = inlined_call_operand.vmem [shape: bf16[4,32], index: 11, kind: input, shape index: {}]   ;;  %s2298_s12 = inlined_call_operand.vmem [shape: f32[32,128], index: 12, kind: output, shape index: {}]  }
   0x1 LB: > { %s1473_s22 = sadd.s32 4294967295, %s1886_s21   ;;  %p1477_p0 = scmp.ge.s32.totalorder %s1886_s21, 1  ;;  %s1886_s21 = sphi %s1955_s21, %s22_s21  }
   0x2   : > { %p374_p1 = scmp.lt.s32.totalorder %s1886_s21, 3 }
   0x4   : > { %p375_p2 = pnand %p1477_p0, %p374_p1 }
   0x5   : > { %s1478_s25 = sshll.u32 (!%p375_p2), %s1473_s22, 1 }
   0x6   : > { %378 = sbr.rel (%p375_p2) target bundleno = 1696 (0x6a0), region = 68  ;;  %p422_p3 = scmp.lt.s32.totalorder (!%p375_p2), %s1478_s25, 3 }
   0xb   : > { %v445_v0 = vld [vmem:[%s2297_s11] sm:$0x3]  ;;  %vm450_vm0 = vcmask 1041408   ;;  %v1888_v1 = vmov 0.0   ;;  %vm1889_vm1 = vmmov 0   ;;  %s2300_s25 = smov (!%p422_p3, %s1478_s25), 3 }
   0xc   : > { %1670 = vmatprep.subr.bf16.mxu0 %v1888_v1  ;;  %v452_v2 = vsel %vm450_vm0, %v445_v0, 0  ;;  %1672 = vmatprep.mubr.msk.bf16.mxu0 %vm1889_vm1, %v1888_v1  ;;  %s1974_s26 = sshll.u32 %s2300_s25, 3  ;;  %vm446_vm2 = vcmask 31744   ;;  %v1828_v5 = vld [vmem:[%s2288_s2 + $0x38] sm:$0xff]   ;;  %v1829_v7 = vld [vmem:[%s2288_s2 + $0x30] sm:$0xff]   ;;  %v1830_v8 = vld [vmem:[%s2288_s2 + $0x28] sm:$0xff]  }
   0xd   : > { %1671 = vmatpush3.bf16.msra.mxu0 %v452_v2  ;;  %1676 = vmatprep.subr.bf16.mxu1 %v1888_v1  ;;  %s431_s29 = scalar_lea.vmem %s2287_s1, %s1974_s26  ;;  %v1831_v9 = vld [vmem:[%s2288_s2 + $0x20] sm:$0xff]   ;;  %v1832_v10 = vld [vmem:[%s2288_s2 + $0x18] sm:$0xff]   ;;  %v1833_v11 = vld [vmem:[%s2288_s2 + $0x10] sm:$0xff]   ;;  %s425_s30 = scalar_lea.vmem %s2286_s0, %s1974_s26  ;;  %vm681_vm3 = vcmask 261120  }
   0xe   : > { %1682 = vmatprep.subr.bf16.mxu0 %v1888_v1  ;;  %1678 = vmatprep.mubr.msk.bf16.mxu1 %vm1889_vm1, %v1888_v1  ;;  %v442_v3 = vld [vmem:[%s431_s29] sm:$0xff]  ;;  %v443_v4 = vld [vmem:[%s431_s29 + $0x8] sm:$0xff]  ;;  %v1838_v36 = vld [vmem:[%s2292_s6 + $0x38] sm:$0xff]   ;;  %s437_s29 = scalar_lea.vmem %s2298_s12, %s1974_s26 }
   0xf   : > { %v444_v6 = vpack.c.bf16 %v443_v4, %v442_v3  ;;  %v1834_v12 = vld [vmem:[%s2288_s2 + $0x8] sm:$0xff]   ;;  %v1835_v13 = vld [vmem:[%s2288_s2] sm:$0xff]   ;;  %v1839_v38 = vld [vmem:[%s2292_s6 + $0x30] sm:$0xff]  }
  0x10   : > { %v2017_v14 = vld [vmem:[%s425_s30] sm:$0xff]  ;;  %v2019_v15 = vld [vmem:[%s425_s30 + $0x8] sm:$0xff]  ;;  %v1842_v41 = vld [vmem:[%s2292_s6 + $0x18] sm:$0xff]  }
  0x11   : > { %1673 = vmatmul.mubr.msk.bf16.vlgmr.msra.gmra.mxu0 %vm446_vm2, %v444_v6  ;;  %v540_v16 = vpack.c.bf16 %v2019_v15, %v2017_v14  ;;  %v495_v17 = vld [vmem:[%s2296_s10] sm:$0x3]  ;;  %v1836_v19 = vld [vmem:[%s2290_s4 + $0x8] sm:$0xff]   ;;  %v1843_v46 = vld [vmem:[%s2292_s6 + $0x10] sm:$0xff]  }
  0x12   : > { %1683 = vmatpush3.bf16.msra.mxu0 %v1828_v5  ;;  %1698 = vmatprep.mubr.msk.bf16.mxu0 %vm1889_vm1, %v1888_v1  ;;  %v497_v18 = vsel %vm450_vm0, %v495_v17, 0  ;;  %v1837_v20 = vld [vmem:[%s2290_s4] sm:$0xff]   ;;  %v1840_v39 = vld [vmem:[%s2292_s6 + $0x28] sm:$0xff]   ;;  %v1846_v49 = vld [vmem:[%s2294_s8 + $0x38] sm:$0xff]  }
  0x13   : > { %1684 = vmatprep.subr.bf16.mxu0 %v1888_v1  ;;  %1677 = vmatpush3.bf16.msra.mxu1 %v497_v18  ;;  %v1486_v25 = vld [vmem:[%s2289_s3] ss:$0 sm:$0xff]  ;;  %v1844_v47 = vld [vmem:[%s2292_s6 + $0x8] sm:$0xff]   ;;  %v1847_v50 = vld [vmem:[%s2294_s8 + $0x30] sm:$0xff]  }
  0x14   : > { %1702 = vmatprep.subr.bf16.mxu1 %v1888_v1  ;;  %v1841_v40 = vld [vmem:[%s2292_s6 + $0x20] sm:$0xff]   ;;  %v1848_v51 = vld [vmem:[%s2294_s8 + $0x28] sm:$0xff]   ;;  %v1850_v2 = vld [vmem:[%s2294_s8 + $0x18] sm:$0xff]  }
  0x15   : > { %v1845_v48 = vld [vmem:[%s2292_s6] sm:$0xff]   ;;  %v1851_v3 = vld [vmem:[%s2294_s8 + $0x10] sm:$0xff]   ;;  %v1852_v4 = vld [vmem:[%s2294_s8 + $0x8] sm:$0xff]  }
  0x16   : > { %1685 = vmatpush3.bf16.msra.mxu0 %v1829_v7  ;;  %1679 = vmatmul.mubr.msk.bf16.vlgmr.msra.gmra.mxu1 %vm446_vm2, %v444_v6  ;;  %v1849_v52 = vld [vmem:[%s2294_s8 + $0x20] sm:$0xff]   ;;  %v1854_v6 = vld [vmem:[%s2288_s2 + $0x78] sm:$0xff]   ;;  %v1855_v7 = vld [vmem:[%s2288_s2 + $0x70] sm:$0xff]  }
  0x17   : > { %1686 = vmatprep.subr.bf16.mxu0 %v1888_v1  ;;  %1706 = vmatprep.mubr.msk.bf16.mxu1 %vm1889_vm1, %v1888_v1  ;;  %v1495_v53 = vld [vmem:[%s2291_s5] ss:$0 sm:$0xff] }
  0x18   : > { %1703 = vmatpush3.bf16.msra.mxu1 %v1836_v19  ;;  %v1853_v5 = vld [vmem:[%s2294_s8] sm:$0xff]  }
  0x19   : > { %1704 = vmatprep.subr.bf16.mxu1 %v1888_v1 }
  0x1a   : > { %1687 = vmatpush3.bf16.msra.mxu0 %v1830_v8  ;;  %v1856_v8 = vld [vmem:[%s2288_s2 + $0x68] sm:$0xff]  }
  0x1b   : > { %1688 = vmatprep.subr.bf16.mxu0 %v1888_v1 }
  0x1c   : > { %1705 = vmatpush3.bf16.msra.mxu1 %v1837_v20 }
  0x1d   : > { %1710 = vmatprep.subr.bf16.mxu1 %v1888_v1 }
  0x1e   : > { %1689 = vmatpush3.bf16.msra.mxu0 %v1831_v9  ;;  %v1857_v9 = vld [vmem:[%s2288_s2 + $0x60] sm:$0xff]  }
  0x1f   : > { %1690 = vmatprep.subr.bf16.mxu0 %v1888_v1 }
  0x22   : > { %1691 = vmatpush3.bf16.msra.mxu0 %v1832_v10  ;;  %v1499_v10 = vld [vmem:[%s2293_s7] ss:$0 sm:$0xff] }
  0x23   : > { %1692 = vmatprep.subr.bf16.mxu0 %v1888_v1 }
  0x26   : > { %1693 = vmatpush3.bf16.msra.mxu0 %v1833_v11 }
  0x27   : > { %1694 = vmatprep.subr.bf16.mxu0 %v1888_v1 }
  0x2a   : > { %1695 = vmatpush3.bf16.msra.mxu0 %v1834_v12 }
  0x2b   : > { %1696 = vmatprep.subr.bf16.mxu0 %v1888_v1 }
  0x2e   : > { %1697 = vmatpush3.bf16.msra.mxu0 %v1835_v13 }
  0x2f   : > { %1730 = vmatprep.subr.bf16.mxu0 %v1888_v1 }
  0x31   : > { %1699 = vmatmul.mubr.bf16.vlgmr.msra.gmra.mxu0 %v540_v16 }
  0x32   : > { %1746 = vmatprep.mubr.msk.bf16.mxu0 %vm1889_vm1, %v1888_v1  ;;  %1731 = vmatpush3.bf16.msra.mxu0 %v1846_v49 }
  0x33   : > { %1732 = vmatprep.subr.bf16.mxu0 %v1888_v1 }
  0x36   : > { %1733 = vmatpush3.bf16.msra.mxu0 %v1847_v50 }
  0x37   : > { %1734 = vmatprep.subr.bf16.mxu0 %v1888_v1 }
  0x3a   : > { %1735 = vmatpush3.bf16.msra.mxu0 %v1848_v51 }
  0x3b   : > { %1736 = vmatprep.subr.bf16.mxu0 %v1888_v1 }
  0x3e   : > { %1737 = vmatpush3.bf16.msra.mxu0 %v1849_v52 }
  0x3f   : > { %1738 = vmatprep.subr.bf16.mxu0 %v1888_v1 }
  0x42   : > { %1739 = vmatpush3.bf16.msra.mxu0 %v1850_v2  ;;  %v1871_v2 = vld [vmem:[%s2292_s6 + $0x40] sm:$0xff]  }
  0x43   : > { %1740 = vmatprep.subr.bf16.mxu0 %v1888_v1 }
  0x46   : > { %1741 = vmatpush3.bf16.msra.mxu0 %v1851_v3  ;;  %v1872_v3 = vld [vmem:[%s2294_s8 + $0x78] sm:$0xff]  }
  0x47   : > { %1742 = vmatprep.subr.bf16.mxu0 %v1888_v1 }
  0x4a   : > { %1743 = vmatpush3.bf16.msra.mxu0 %v1852_v4  ;;  %v1873_v4 = vld [vmem:[%s2294_s8 + $0x70] sm:$0xff]  }
  0x4b   : > { %1744 = vmatprep.subr.bf16.mxu0 %v1888_v1 }
  0x4e   : > { %1745 = vmatpush3.bf16.msra.mxu0 %v1853_v5  ;;  %v1874_v5 = vld [vmem:[%s2294_s8 + $0x68] sm:$0xff]  }
  0x4f   : > { %1770 = vmatprep.subr.bf16.mxu0 %v1888_v1 }
  0xd1   : > { %v2043_v21 = vpop.f32.mrf.mxu0 }
  0xd3   : > { %v1674_v22 = vpop.f32.mrf.mxu0 }
  0xd5   : > { %v2045_v23 = vpop.f32.mrf.mxu0 }
  0xd6   : > { %v2075_v42 = vpop.f32.mrf.mxu1 }
  0xd7   : > { %v1675_v24 = vpop.f32.mrf.mxu0 }
  0xd8   : > { %v1680_v43 = vpop.f32.mrf.mxu1 }
  0xda   : > { %v2077_v44 = vpop.f32.mrf.mxu1 }
  0xdc   : > { %v1681_v45 = vpop.f32.mrf.mxu1 }
  0xf1   : > { %v646_v26 = vpop.f32.mrf.mxu0 }
  0xf2   : > { %v647_v27 = vadd.f32 %v1486_v25, %v646_v26 }
  0xf3   : > { %v1700_v28 = vpop.f32.mrf.mxu0 }
  0xf4   : > { %v653_v30 = vmax.f32 %v647_v27, 0.0  ;;  %v1858_v28 = vld [vmem:[%s2288_s2 + $0x58] sm:$0xff]  }
  0xf5   : > { %v649_v29 = vpop.f32.mrf.mxu0 }
  0xf6   : > { %v650_v31 = vadd.f32 %v1486_v25, %v649_v29  ;;  %v655_v34 = vmul.f32 %v653_v30, %v2043_v21  ;;  %v1859_v29 = vld [vmem:[%s2288_s2 + $0x50] sm:$0xff]   ;;  %v1508_v30 = vld [vmem:[%s2295_s9] ss:$0 sm:$0xff] }
  0xf7   : > { %v1701_v32 = vpop.f32.mrf.mxu0 }
  0xf8   : > { %v654_v33 = vmax.f32 %v650_v31, 0.0 }
  0xfa   : > { %v656_v35 = vmul.f32 %v654_v33, %v2045_v23 }
  0xfc   : > { %v657_v37 = vpack.c.bf16 %v656_v35, %v655_v34 }
  0xfe   : > { %1707 = vmatmul.mubr.msk.bf16.vlgmr.msra.gmra.mxu1 %vm681_vm3, %v657_v37 }
  0xff   : > { %1711 = vmatpush3.bf16.msra.mxu1 %v1838_v36  ;;  %1726 = vmatprep.mubr.msk.bf16.mxu1 %vm1889_vm1, %v1888_v1 }
 0x100   : > { %1712 = vmatprep.subr.bf16.mxu1 %v1888_v1 }
 0x103   : > { %1713 = vmatpush3.bf16.msra.mxu1 %v1839_v38 }
 0x104   : > { %1714 = vmatprep.subr.bf16.mxu1 %v1888_v1 }
 0x107   : > { %1715 = vmatpush3.bf16.msra.mxu1 %v1840_v39 }
 0x108   : > { %1716 = vmatprep.subr.bf16.mxu1 %v1888_v1 }
 0x10b   : > { %1717 = vmatpush3.bf16.msra.mxu1 %v1841_v40 }
 0x10c   : > { %1718 = vmatprep.subr.bf16.mxu1 %v1888_v1 }
 0x10f   : > { %1719 = vmatpush3.bf16.msra.mxu1 %v1842_v41 }
 0x110   : > { %1720 = vmatprep.subr.bf16.mxu1 %v1888_v1 }
 0x113   : > { %1721 = vmatpush3.bf16.msra.mxu1 %v1843_v46  ;;  %v1862_v46 = vld [vmem:[%s2290_s4 + $0x18] sm:$0xff]  }
 0x114   : > { %1722 = vmatprep.subr.bf16.mxu1 %v1888_v1 }
 0x117   : > { %1723 = vmatpush3.bf16.msra.mxu1 %v1844_v47  ;;  %v1863_v47 = vld [vmem:[%s2290_s4 + $0x10] sm:$0xff]  }
 0x118   : > { %1724 = vmatprep.subr.bf16.mxu1 %v1888_v1 }
 0x11b   : > { %1725 = vmatpush3.bf16.msra.mxu1 %v1845_v48  ;;  %v1534_v48 = vld [vmem:[%s2289_s3 + $0x1] ss:$0 sm:$0xff] }
 0x11c   : > { %1750 = vmatprep.subr.bf16.mxu1 %v1888_v1 }
 0x1be   : > { %v719_v54 = vpop.f32.mrf.mxu1 }
 0x1bf   : > { %v720_v55 = vadd.f32 %v1495_v53, %v719_v54 }
 0x1c0   : > { %v1708_v56 = vpop.f32.mrf.mxu1 }
 0x1c1   : > { %v726_v58 = vmax.f32 %v720_v55, 0.0 }
 0x1c2   : > { %v722_v57 = vpop.f32.mrf.mxu1 }
 0x1c3   : > { %v723_v59 = vadd.f32 %v1495_v53, %v722_v57  ;;  %v728_v62 = vmul.f32 %v726_v58, %v2075_v42 }
 0x1c4   : > { %v1709_v60 = vpop.f32.mrf.mxu1 }
 0x1c5   : > { %v727_v61 = vmax.f32 %v723_v59, 0.0  ;;  %v1864_v59 = vld [vmem:[%s2292_s6 + $0x78] sm:$0xff]  }
 0x1c7   : > { %v729_v63 = vmul.f32 %v727_v61, %v2077_v44  ;;  %v1865_v61 = vld [vmem:[%s2292_s6 + $0x70] sm:$0xff]  }
 0x1c9   : > { %v730_v0 = vpack.c.bf16 %v729_v63, %v728_v62  ;;  %v1868_v62 = vld [vmem:[%s2292_s6 + $0x58] sm:$0xff]   ;;  %v1869_v63 = vld [vmem:[%s2292_s6 + $0x50] sm:$0xff]  }
 0x1cb   : > { %1727 = vmatmul.mubr.bf16.vlgmr.msra.gmra.mxu1 %v730_v0  ;;  %v1870_v0 = vld [vmem:[%s2292_s6 + $0x48] sm:$0xff]  }
 0x1cc   : > { %1766 = vmatprep.mubr.msk.bf16.mxu1 %vm1889_vm1, %v1888_v1  ;;  %1751 = vmatpush3.bf16.msra.mxu1 %v1854_v6  ;;  %v1875_v6 = vld [vmem:[%s2294_s8 + $0x60] sm:$0xff]  }
 0x1cd   : > { %1752 = vmatprep.subr.bf16.mxu1 %v1888_v1 }
 0x1d0   : > { %1753 = vmatpush3.bf16.msra.mxu1 %v1855_v7  ;;  %v1548_v7 = vld [vmem:[%s2291_s5 + $0x1] ss:$0 sm:$0xff] }
 0x1d1   : > { %1754 = vmatprep.subr.bf16.mxu1 %v1888_v1 }
 0x1d4   : > { %1755 = vmatpush3.bf16.msra.mxu1 %v1856_v8 }
 0x1d5   : > { %1756 = vmatprep.subr.bf16.mxu1 %v1888_v1 }
 0x1d8   : > { %1757 = vmatpush3.bf16.msra.mxu1 %v1857_v9 }
 0x1d9   : > { %1758 = vmatprep.subr.bf16.mxu1 %v1888_v1 }
 0x1dc   : > { %1759 = vmatpush3.bf16.msra.mxu1 %v1858_v28 }
 0x1dd   : > { %1760 = vmatprep.subr.bf16.mxu1 %v1888_v1 }
 0x1e0   : > { %1761 = vmatpush3.bf16.msra.mxu1 %v1859_v29 }
 0x1e1   : > { %1762 = vmatprep.subr.bf16.mxu1 %v1888_v1 }
 0x28b   : > { %v836_v11 = vpop.f32.mrf.mxu1 }
 0x28c   : > { %v837_v12 = vadd.f32 %v1499_v10, %v836_v11 }
 0x28d   : > { %v1728_v13 = vpop.f32.mrf.mxu1 }
 0x28e   : > { %v843_v16 = vmax.f32 %v837_v12, 0.0 }
 0x28f   : > { %v839_v17 = vpop.f32.mrf.mxu1 }
 0x290   : > { %v840_v18 = vadd.f32 %v1499_v10, %v839_v17  ;;  %v845_v20 = vmul.f32 %v843_v16, %v2075_v42 }
 0x291   : > { %v1729_v19 = vpop.f32.mrf.mxu1 }
 0x292   : > { %v844_v22 = vmax.f32 %v840_v18, 0.0  ;;  %v847_v25 = vadd.f32 %v845_v20, %v2017_v14  ;;  %v1860_v14 = vld [vmem:[%s2288_s2 + $0x48] sm:$0xff]  }
 0x293   : > { %1763 = vmatpush3.bf16.msra.mxu1 %v1860_v14 }
 0x294   : > { %v846_v24 = vmul.f32 %v844_v22, %v2077_v44  ;;  %1764 = vmatprep.subr.bf16.mxu1 %v1888_v1  ;;  %v1876_v22 = vld [vmem:[%s2294_s8 + $0x58] sm:$0xff]  }
 0x296   : > { %v848_v26 = vadd.f32 %v846_v24, %v2019_v15  ;;  %v1861_v15 = vld [vmem:[%s2288_s2 + $0x40] sm:$0xff]   ;;  %v1877_v24 = vld [vmem:[%s2294_s8 + $0x50] sm:$0xff]  }
 0x297   : > { %1765 = vmatpush3.bf16.msra.mxu1 %v1861_v15 }
 0x298   : > { %v849_v27 = vpack.c.bf16 %v848_v26, %v847_v25  ;;  %1798 = vmatprep.subr.bf16.mxu1 %v1888_v1 }
 0x29a   : > { %1747 = vmatmul.mubr.bf16.vlgmr.msra.gmra.mxu0 %v849_v27  ;;  %v1569_v27 = vld [vmem:[%s2293_s7 + $0x1] ss:$0 sm:$0xff] }
 0x29b   : > { %1774 = vmatprep.mubr.msk.bf16.mxu0 %vm1889_vm1, %v1888_v1  ;;  %1771 = vmatpush3.bf16.msra.mxu0 %v1862_v46 }
 0x29c   : > { %1772 = vmatprep.subr.bf16.mxu0 %v1888_v1 }
 0x29f   : > { %1773 = vmatpush3.bf16.msra.mxu0 %v1863_v47 }
 0x2a0   : > { %1778 = vmatprep.subr.bf16.mxu0 %v1888_v1 }
 0x35a   : > { %v955_v31 = vpop.f32.mrf.mxu0 }
 0x35b   : > { %v956_v32 = vadd.f32 %v1508_v30, %v955_v31 }
 0x35c   : > { %v1748_v33 = vpop.f32.mrf.mxu0 }
 0x35d   : > { %v962_v34 = vmax.f32 %v956_v32, 0.0 }
 0x35e   : > { %v958_v35 = vpop.f32.mrf.mxu0 }
 0x35f   : > { %v959_v36 = vadd.f32 %v1508_v30, %v958_v35  ;;  %v964_v38 = vmul.f32 %v962_v34, %v2075_v42 }
 0x360   : > { %v1749_v37 = vpop.f32.mrf.mxu0 }
 0x361   : > { %v963_v39 = vmax.f32 %v959_v36, 0.0  ;;  %v2176_v41 = vadd.f32 %v964_v38, %v847_v25  ;;  %v1878_v25 = vld [vmem:[%s2294_s8 + $0x48] sm:$0xff]   ;;  %v1595_v38 = vld [vmem:[%s2295_s9 + $0x1] ss:$0 sm:$0xff] }
 0x363   : > { %v965_v40 = vmul.f32 %v963_v39, %v2077_v44 }
 0x365   : > { %v2178_v43 = vadd.f32 %v965_v40, %v848_v26  ;;  %v1879_v26 = vld [vmem:[%s2294_s8 + $0x40] sm:$0xff]  }
 0x367   : > { %v968_v45 = vpack.c.bf16 %v2178_v43, %v2176_v41 }
 0x369   : > { %1767 = vmatmul.mubr.bf16.vlgmr.msra.gmra.mxu1 %v968_v45 }
 0x36a   : > { %1814 = vmatprep.mubr.msk.bf16.mxu1 %vm1889_vm1, %v1888_v1  ;;  %1799 = vmatpush3.bf16.msra.mxu1 %v1872_v3 }
 0x36b   : > { %1800 = vmatprep.subr.bf16.mxu1 %v1888_v1 }
 0x36e   : > { %1801 = vmatpush3.bf16.msra.mxu1 %v1873_v4 }
 0x36f   : > { %1802 = vmatprep.subr.bf16.mxu1 %v1888_v1 }
 0x372   : > { %1803 = vmatpush3.bf16.msra.mxu1 %v1874_v5 }
 0x373   : > { %1804 = vmatprep.subr.bf16.mxu1 %v1888_v1 }
 0x376   : > { %1805 = vmatpush3.bf16.msra.mxu1 %v1875_v6 }
 0x377   : > { %1806 = vmatprep.subr.bf16.mxu1 %v1888_v1 }
 0x37a   : > { %1807 = vmatpush3.bf16.msra.mxu1 %v1876_v22 }
 0x37b   : > { %1808 = vmatprep.subr.bf16.mxu1 %v1888_v1 }
 0x37e   : > { %1809 = vmatpush3.bf16.msra.mxu1 %v1877_v24 }
 0x37f   : > { %1810 = vmatprep.subr.bf16.mxu1 %v1888_v1 }
 0x382   : > { %1811 = vmatpush3.bf16.msra.mxu1 %v1878_v25 }
 0x383   : > { %1812 = vmatprep.subr.bf16.mxu1 %v1888_v1 }
 0x386   : > { %1813 = vmatpush3.bf16.msra.mxu1 %v1879_v26 }
 0x429   : > { %v1076_v49 = vpop.f32.mrf.mxu1 }
 0x42a   : > { %v1077_v50 = vadd.f32 %v1534_v48, %v1076_v49 }
 0x42b   : > { %v1768_v51 = vpop.f32.mrf.mxu1 }
 0x42c   : > { %v1083_v53 = vmax.f32 %v1077_v50, 0.0 }
 0x42d   : > { %v1079_v52 = vpop.f32.mrf.mxu1 }
 0x42e   : > { %v1080_v54 = vadd.f32 %v1534_v48, %v1079_v52  ;;  %v1085_v57 = vmul.f32 %v1083_v53, %v2043_v21  ;;  %v1866_v21 = vld [vmem:[%s2292_s6 + $0x68] sm:$0xff]  }
 0x42f   : > { %v1769_v55 = vpop.f32.mrf.mxu1 }
 0x430   : > { %v1084_v56 = vmax.f32 %v1080_v54, 0.0 }
 0x432   : > { %v1086_v58 = vmul.f32 %v1084_v56, %v2045_v23  ;;  %v1867_v23 = vld [vmem:[%s2292_s6 + $0x60] sm:$0xff]  }
 0x434   : > { %v1087_v60 = vpack.c.bf16 %v1086_v58, %v1085_v57 }
 0x436   : > { %1775 = vmatmul.mubr.msk.bf16.vlgmr.msra.gmra.mxu0 %vm681_vm3, %v1087_v60 }
 0x437   : > { %1779 = vmatpush3.bf16.msra.mxu0 %v1864_v59  ;;  %1794 = vmatprep.mubr.msk.bf16.mxu0 %vm1889_vm1, %v1888_v1 }
 0x438   : > { %1780 = vmatprep.subr.bf16.mxu0 %v1888_v1 }
 0x43b   : > { %1781 = vmatpush3.bf16.msra.mxu0 %v1865_v61 }
 0x43c   : > { %1782 = vmatprep.subr.bf16.mxu0 %v1888_v1 }
 0x43f   : > { %1783 = vmatpush3.bf16.msra.mxu0 %v1866_v21 }
 0x440   : > { %1784 = vmatprep.subr.bf16.mxu0 %v1888_v1 }
 0x443   : > { %1785 = vmatpush3.bf16.msra.mxu0 %v1867_v23 }
 0x444   : > { %1786 = vmatprep.subr.bf16.mxu0 %v1888_v1 }
 0x447   : > { %1787 = vmatpush3.bf16.msra.mxu0 %v1868_v62 }
 0x448   : > { %1788 = vmatprep.subr.bf16.mxu0 %v1888_v1 }
 0x44b   : > { %1789 = vmatpush3.bf16.msra.mxu0 %v1869_v63 }
 0x44c   : > { %1790 = vmatprep.subr.bf16.mxu0 %v1888_v1 }
 0x44f   : > { %1791 = vmatpush3.bf16.msra.mxu0 %v1870_v0 }
 0x450   : > { %1792 = vmatprep.subr.bf16.mxu0 %v1888_v1 }
 0x453   : > { %1793 = vmatpush3.bf16.msra.mxu0 %v1871_v2 }
 0x4f6   : > { %v1150_v8 = vpop.f32.mrf.mxu0 }
 0x4f7   : > { %v1151_v9 = vadd.f32 %v1548_v7, %v1150_v8 }
 0x4f8   : > { %v1776_v10 = vpop.f32.mrf.mxu0 }
 0x4f9   : > { %v1157_v12 = vmax.f32 %v1151_v9, 0.0 }
 0x4fa   : > { %v1153_v11 = vpop.f32.mrf.mxu0 }
 0x4fb   : > { %v1154_v13 = vadd.f32 %v1548_v7, %v1153_v11  ;;  %v1159_v18 = vmul.f32 %v1157_v12, %v2075_v42 }
 0x4fc   : > { %v1777_v16 = vpop.f32.mrf.mxu0 }
 0x4fd   : > { %v1158_v17 = vmax.f32 %v1154_v13, 0.0 }
 0x4ff   : > { %v1160_v19 = vmul.f32 %v1158_v17, %v2077_v44 }
 0x501   : > { %v1161_v20 = vpack.c.bf16 %v1160_v19, %v1159_v18 }
 0x503   : > { %1795 = vmatmul.mubr.bf16.vlgmr.msra.gmra.mxu0 %v1161_v20 }
 0x5c3   : > { %v1269_v28 = vpop.f32.mrf.mxu0 }
 0x5c4   : > { %v1270_v29 = vadd.f32 %v1569_v27, %v1269_v28 }
 0x5c5   : > { %v1796_v14 = vpop.f32.mrf.mxu0 }
 0x5c6   : > { %v1276_v15 = vmax.f32 %v1270_v29, 0.0 }
 0x5c7   : > { %v1272_v30 = vpop.f32.mrf.mxu0 }
 0x5c8   : > { %v1273_v31 = vadd.f32 %v1569_v27, %v1272_v30  ;;  %v1278_v33 = vmul.f32 %v1276_v15, %v2075_v42 }
 0x5c9   : > { %v1797_v32 = vpop.f32.mrf.mxu0 }
 0x5ca   : > { %v1277_v1 = vmax.f32 %v1273_v31, 0.0  ;;  %v1280_v35 = vadd.f32 %v1278_v33, %v2176_v41 }
 0x5cc   : > { %v1279_v34 = vmul.f32 %v1277_v1, %v2077_v44 }
 0x5ce   : > { %v1281_v36 = vadd.f32 %v1279_v34, %v2178_v43 }
 0x5d0   : > { %v1282_v37 = vpack.c.bf16 %v1281_v36, %v1280_v35 }
 0x5d2   : > { %1815 = vmatmul.mubr.bf16.vlgmr.msra.gmra.mxu1 %v1282_v37 }
 0x692   : > { %v1390_v39 = vpop.f32.mrf.mxu1 }
 0x693   : > { %v1391_v40 = vadd.f32 %v1595_v38, %v1390_v39 }
 0x694   : > { %v1816_v45 = vpop.f32.mrf.mxu1 }
 0x695   : > { %v1397_v46 = vmax.f32 %v1391_v40, 0.0 }
 0x696   : > { %v1393_v47 = vpop.f32.mrf.mxu1 }
 0x697   : > { %v1399_v48 = vmul.f32 %v1397_v46, %v2075_v42  ;;  %v1394_v49 = vadd.f32 %v1595_v38, %v1393_v47 }
 0x698   : > { %v1817_v41 = vpop.f32.mrf.mxu1 }
 0x699   : > { %v1401_v43 = vadd.f32 %v1399_v48, %v1280_v35  ;;  %v1398_v50 = vmax.f32 %v1394_v49, 0.0 }
 0x69b   : > { %1403 = vst [vmem:[%s437_s29] sm:$0xff] %v1401_v43  ;;  %v1400_v51 = vmul.f32 %v1398_v50, %v2077_v44 }
 0x69d   : > { %v1402_v52 = vadd.f32 %v1400_v51, %v1281_v36 }
 0x69f   : > { %1404 = vst [vmem:[%s437_s29 + $0x8] sm:$0xff] %v1402_v52 }
 0x6a0 PF: > { %s22_s21 = sadd.s32 1, %s1886_s21  }
 0x6a1   : > { %p19_p4 = scmp.ge.s32.totalorder %s22_s21, 4  }
 0x6a3   :  { %21 = sbr.rel (!%p19_p4) target bundleno = 1 (0x1), region = 109 }

</bundles_post_ra>
